<compile_context>
chip_gen: v5e
topology: v5e:2x2
jax: 0.10.0
libtpu: 0.0.40
codegen_flags: <defaults>
</compile_context>

<pallas_src>
import functools

import jax
import jax.numpy as jnp
from jax.experimental import pallas as pl
from jax.experimental.pallas import tpu as pltpu


MAX_TILE_B = 1024          # cap on batch rows per grid step
VMEM_LIMIT_BYTES = 16 * 1024 * 1024


def _round_up(x, m):
    return ((x + m - 1) // m) * m


def _pick_tile_b(batch):
    """Batch tile: multiple of 8 (sublanes), capped at MAX_TILE_B.

    For moderate/large batches, size the tile so the grid has >= 2 steps: on v7x the
    "parallel" batch axis is what shards work across the 2 TensorCores (no-op on
    v5e/v6e, which have a single TC).
    """
    if batch <= 8:
        return 8
    half = -(-batch // 2)                              # cdiv(batch, 2)
    tb = min(MAX_TILE_B, _round_up(half, 128))
    return int(min(tb, _round_up(batch, 8)))


# ---------------------------------------------------------------------------
# Kernels
# ---------------------------------------------------------------------------

def _mlp_kernel(x_ref, w1_ref, b1_ref, w2_ref, b2_ref, o_ref):
    """Fused 2-layer MLP on one batch tile: relu(relu(x@W1+b1)@W2+b2).

    x tile: (tile_b, obs_dim) f32; W1: (obs_dim, H) bf16; W2: (H, H) bf16; biases f32.
    MXU matmuls run in bf16 with f32 accumulation; elementwise stays f32 (v5e-safe).
    """
    x = x_ref[...].astype(jnp.bfloat16)

    h1 = jnp.dot(x, w1_ref[...], preferred_element_type=jnp.float32)
    h1 = jnp.maximum(h1 + b1_ref[...], 0.0)

    h2 = jnp.dot(h1.astype(jnp.bfloat16), w2_ref[...],
                 preferred_element_type=jnp.float32)
    h2 = jnp.maximum(h2 + b2_ref[...], 0.0)

    o_ref[...] = h2.astype(o_ref.dtype)


def _mlp_heads_kernel(x_ref, w1_ref, b1_ref, w2_ref, b2_ref, wh_ref, bh_ref,
                      heads_ref):
    """fc MLP + fused heads: heads = relu-MLP(x) @ [W_actor | W_critic] + [b_a | b_c].

    The (tile_b, H) hidden slab never leaves VMEM; only the tiny (tile_b, A+1)
    head outputs are written to HBM.
    """
    x = x_ref[...].astype(jnp.bfloat16)

    h1 = jnp.dot(x, w1_ref[...], preferred_element_type=jnp.float32)
    h1 = jnp.maximum(h1 + b1_ref[...], 0.0)

    h2 = jnp.dot(h1.astype(jnp.bfloat16), w2_ref[...],
                 preferred_element_type=jnp.float32)
    h2 = jnp.maximum(h2 + b2_ref[...], 0.0)

    heads = jnp.dot(h2.astype(jnp.bfloat16), wh_ref[...],
                    preferred_element_type=jnp.float32) + bh_ref[...]
    heads_ref[...] = heads.astype(heads_ref.dtype)


# ---------------------------------------------------------------------------
# pallas_call wrappers
# ---------------------------------------------------------------------------

@functools.partial(jax.jit, static_argnames=("tile_b", "out_dtype"))
def _fc_forward(x, w1, b1, w2, b2, *, tile_b, out_dtype):
    batch, obs_dim = x.shape
    hidden_dim = w1.shape[1]
    nb = pl.cdiv(batch, tile_b)

    flops = 2 * batch * obs_dim * hidden_dim + 2 * batch * hidden_dim * hidden_dim
    out_bytes = batch * hidden_dim * jnp.dtype(out_dtype).itemsize
    bytes_accessed = int(x.size * 4 + w1.size * 2 + w2.size * 2
                         + b1.size * 4 + b2.size * 4 + out_bytes)

    return pl.pallas_call(
        _mlp_kernel,
        out_shape=jax.ShapeDtypeStruct((batch, hidden_dim), out_dtype),
        grid_spec=pltpu.PrefetchScalarGridSpec(
            num_scalar_prefetch=0,
            grid=(nb,),
            in_specs=[
                # x: one batch tile per step; last dim == full obs_dim (no K pad).
                pl.BlockSpec((tile_b, obs_dim), lambda i: (i, 0)),
                # weights/biases: constant index_map -> resident in VMEM across steps.
                pl.BlockSpec((obs_dim, hidden_dim), lambda i: (0, 0)),
                pl.BlockSpec((1, hidden_dim), lambda i: (0, 0)),
                pl.BlockSpec((hidden_dim, hidden_dim), lambda i: (0, 0)),
                pl.BlockSpec((1, hidden_dim), lambda i: (0, 0)),
            ],
            out_specs=pl.BlockSpec((tile_b, hidden_dim), lambda i: (i, 0)),
        ),
        compiler_params=pltpu.CompilerParams(
            dimension_semantics=("parallel",),     # shards batch tiles across TCs (v7x)
            vmem_limit_bytes=VMEM_LIMIT_BYTES,
        ),
        cost_estimate=pl.CostEstimate(
            flops=flops, transcendentals=0, bytes_accessed=bytes_accessed),
    )(x, w1, b1, w2, b2)


@functools.partial(jax.jit, static_argnames=("tile_b",))
def _fc_heads_forward(x, w1, b1, w2, b2, wh, bh, *, tile_b):
    batch, obs_dim = x.shape
    hidden_dim = w1.shape[1]
    n_heads = wh.shape[1]
    nb = pl.cdiv(batch, tile_b)

    flops = (2 * batch * obs_dim * hidden_dim
             + 2 * batch * hidden_dim * hidden_dim
             + 2 * batch * hidden_dim * n_heads)
    bytes_accessed = int(x.size * 4 + w1.size * 2 + w2.size * 2 + wh.size * 2
                         + b1.size * 4 + b2.size * 4 + bh.size * 4
                         + batch * n_heads * 4)

    return pl.pallas_call(
        _mlp_heads_kernel,
        out_shape=jax.ShapeDtypeStruct((batch, n_heads), jnp.float32),
        grid_spec=pltpu.PrefetchScalarGridSpec(
            num_scalar_prefetch=0,
            grid=(nb,),
            in_specs=[
                pl.BlockSpec((tile_b, obs_dim), lambda i: (i, 0)),
                pl.BlockSpec((obs_dim, hidden_dim), lambda i: (0, 0)),
                pl.BlockSpec((1, hidden_dim), lambda i: (0, 0)),
                pl.BlockSpec((hidden_dim, hidden_dim), lambda i: (0, 0)),
                pl.BlockSpec((1, hidden_dim), lambda i: (0, 0)),
                pl.BlockSpec((hidden_dim, n_heads), lambda i: (0, 0)),
                pl.BlockSpec((1, n_heads), lambda i: (0, 0)),
            ],
            out_specs=pl.BlockSpec((tile_b, n_heads), lambda i: (i, 0)),
        ),
        compiler_params=pltpu.CompilerParams(
            dimension_semantics=("parallel",),
            vmem_limit_bytes=VMEM_LIMIT_BYTES,
        ),
        cost_estimate=pl.CostEstimate(
            flops=flops, transcendentals=0, bytes_accessed=bytes_accessed),
    )(x, w1, b1, w2, b2, wh, bh)


# ---------------------------------------------------------------------------
# Public API (mirrors PPO.forward / value / pi)
# ---------------------------------------------------------------------------

def prepare_params(w1_f32, b1_f32, w2_f32, b2_f32):
    """Cast fc weights to bf16 (intentional precision tradeoff vs torch f32 Linear).

    Layout is (in, out) — the transpose of torch.nn.Linear.weight.  Biases stay f32
    with shape (1, hidden).  No K-padding (the kernel streams x at its true obs_dim).
    """
    hidden_dim = w1_f32.shape[1]
    return (
        w1_f32.astype(jnp.bfloat16),
        b1_f32.reshape(1, hidden_dim).astype(jnp.float32),
        w2_f32.astype(jnp.bfloat16),
        b2_f32.reshape(1, hidden_dim).astype(jnp.float32),
    )


def prepare_head_params(w_actor, b_actor, w_critic, b_critic, logstd):
    """Concatenate actor_mean and critic into one (hidden, num_actions+1) bf16 matrix."""
    num_actions = w_actor.shape[1]
    wh = jnp.concatenate([w_actor, w_critic], axis=1).astype(jnp.bfloat16)
    bh = jnp.concatenate(
        [b_actor.reshape(1, -1), b_critic.reshape(1, -1)], axis=1).astype(jnp.float32)
    return wh, bh, jnp.asarray(logstd, jnp.float32), num_actions


def _format_obs(obs):
    x = jnp.asarray(obs, dtype=jnp.float32)
    if x.ndim == 1:                       # _format: unsqueeze(0)
        x = x[None, :]
    return x


def ppo_forward(obs, params, *, tile_b=None, out_dtype=jnp.float32):
    """PPO.forward: _format (unsqueeze single obs, cast f32) then fc MLP.

    obs: (obs_dim,) or (batch, obs_dim).  Returns (batch, hidden_dim) activations
    (batch=1 for a single observation, matching PyTorch's unsqueeze(0)).
    Set out_dtype=jnp.bfloat16 if downstream consumers tolerate it (halves the
    dominant output HBM stream).
    """
    w1, b1, w2, b2 = params
    x = _format_obs(obs)
    if tile_b is None:
        tile_b = _pick_tile_b(x.shape[0])
    return _fc_forward(x, w1, b1, w2, b2, tile_b=tile_b, out_dtype=out_dtype)


def ppo_pi_and_value(obs, params, head_params, *, tile_b=None):
    """Fused PPO.pi + PPO.value: (mu, std, value).

    The hidden activations stay in VMEM; only the (batch, num_actions+1) head outputs
    hit HBM.  tanh / exp(logstd) are cheap wrapper-side ops on tiny arrays.
    """
    w1, b1, w2, b2 = params
    wh, bh, logstd, num_actions = head_params
    x = _format_obs(obs)
    if tile_b is None:
        tile_b = _pick_tile_b(x.shape[0])
    heads = _fc_heads_forward(x, w1, b1, w2, b2, wh, bh, tile_b=tile_b)
    mu = jnp.tanh(heads[:, :num_actions])
    value = heads[:, num_actions:]
    std = jnp.broadcast_to(jnp.exp(logstd), mu.shape)
    return mu, std, value


def init_params(key, obs_dim, hidden_dim, num_actions):
    """Deterministic init mirroring torch.nn.Linear default U(-1/sqrt(in), 1/sqrt(in))."""
    ks = jax.random.split(key, 8)
    b_in = 1.0 / jnp.sqrt(jnp.float32(obs_dim))
    b_h = 1.0 / jnp.sqrt(jnp.float32(hidden_dim))
    w1 = jax.random.uniform(ks[0], (obs_dim, hidden_dim), jnp.float32, -b_in, b_in)
    b1 = jax.random.uniform(ks[1], (1, hidden_dim), jnp.float32, -b_in, b_in)
    w2 = jax.random.uniform(ks[2], (hidden_dim, hidden_dim), jnp.float32, -b_h, b_h)
    b2 = jax.random.uniform(ks[3], (1, hidden_dim), jnp.float32, -b_h, b_h)
    wa = jax.random.uniform(ks[4], (hidden_dim, num_actions), jnp.float32, -b_h, b_h)
    ba = jax.random.uniform(ks[5], (1, num_actions), jnp.float32, -b_h, b_h)
    wc = jax.random.uniform(ks[6], (hidden_dim, 1), jnp.float32, -b_h, b_h)
    bc = jax.random.uniform(ks[7], (1, 1), jnp.float32, -b_h, b_h)
    logstd = jnp.zeros((1, num_actions), jnp.float32)
    return (w1, b1, w2, b2), (wa, ba, wc, bc, logstd)


if __name__ == "__main__":
    obs_dim = 16       # small synthetic observation size
    hidden_dim = 128   # PPO default hidden_dim=128
    num_actions = 4
    batch = 256        # vectorized rollout batch

    key = jax.random.PRNGKey(0)
    k_obs, k_params = jax.random.split(key)

    obs_batch = jax.random.normal(k_obs, (batch, obs_dim), jnp.float32)
    obs_uneven = obs_batch[:200]           # exercises the partial last block
    obs_single = obs_batch[0]              # raw unbatched observation

    (w1_f, b1_f, w2_f, b2_f), (wa_f, ba_f, wc_f, bc_f, logstd) = init_params(
        k_params, obs_dim, hidden_dim, num_actions)
    params = prepare_params(w1_f, b1_f, w2_f, b2_f)
    head_params = prepare_head_params(wa_f, ba_f, wc_f, bc_f, logstd)

    # --- Kernel runs -------------------------------------------------------
    hidden_b = jax.block_until_ready(ppo_forward(obs_batch, params))
    hidden_u = jax.block_until_ready(ppo_forward(obs_uneven, params))
    hidden_1 = jax.block_until_ready(ppo_forward(obs_single, params))
    hidden_bf16 = jax.block_until_ready(
        ppo_forward(obs_batch, params, out_dtype=jnp.bfloat16))
    mu, std, value = jax.tree_util.tree_map(
        jax.block_until_ready, ppo_pi_and_value(obs_batch, params, head_params))

    # --- Pure-JAX reference (same bf16 weights / f32 accumulation) ---------
    w1_p, b1_p, w2_p, b2_p = params
    wh_p, bh_p, logstd_p, _ = head_params

    def ref_fc(x):
        xb = x.astype(jnp.bfloat16)
        h1 = jnp.maximum(
            jnp.dot(xb, w1_p, preferred_element_type=jnp.float32) + b1_p, 0.0)
        h2 = jnp.maximum(
            jnp.dot(h1.astype(jnp.bfloat16), w2_p,
                    preferred_element_type=jnp.float32) + b2_p, 0.0)
        return h2

    def ref_heads(x):
        h2 = ref_fc(x)
        return jnp.dot(h2.astype(jnp.bfloat16), wh_p,
                       preferred_element_type=jnp.float32) + bh_p

    ref_b = ref_fc(obs_batch)
    ref_u = ref_fc(obs_uneven)
    ref_1 = ref_fc(obs_single[None, :])
    ref_h = ref_heads(obs_batch)
    ref_mu = jnp.tanh(ref_h[:, :num_actions])
    ref_val = ref_h[:, num_actions:]

    assert hidden_b.shape == (batch, hidden_dim)
    assert hidden_u.shape == (200, hidden_dim)
    assert hidden_1.shape == (1, hidden_dim)
    assert mu.shape == (batch, num_actions) and value.shape == (batch, 1)
    assert jnp.allclose(hidden_b, ref_b, atol=1e-3, rtol=1e-3)
    assert jnp.allclose(hidden_u, ref_u, atol=1e-3, rtol=1e-3)
    assert jnp.allclose(hidden_1, ref_1, atol=1e-3, rtol=1e-3)
    assert jnp.allclose(hidden_bf16.astype(jnp.float32), ref_b, atol=2e-2, rtol=2e-2)
    assert jnp.allclose(mu, ref_mu, atol=1e-3, rtol=1e-3)
    assert jnp.allclose(value, ref_val, atol=1e-3, rtol=1e-3)
    assert jnp.allclose(std, jnp.exp(logstd_p) * jnp.ones_like(mu), atol=1e-6)

    # TODO(synk): sample_action's Normal sampling / log_prob / entropy stay in plain
    # JAX (jax.random) on the tiny (batch, num_actions) outputs — not a kernel op.

    print("KERNEL_OK")
</pallas_src>

<mosaic_0001>
module attributes {stable_mosaic.version = 11 : i64} {
  func.func @_mlp_kernel(%arg0: i32, %arg1: memref<128x16xf32, #tpu.memory_space<vmem>>, %arg2: memref<16x128xbf16, #tpu.memory_space<vmem>>, %arg3: memref<1x128xf32, #tpu.memory_space<vmem>>, %arg4: memref<128x128xbf16, #tpu.memory_space<vmem>>, %arg5: memref<1x128xf32, #tpu.memory_space<vmem>>, %arg6: memref<128x128xf32, #tpu.memory_space<vmem>>) attributes {dimension_semantics = [#tpu.dimension_semantics<parallel>], iteration_bounds = array<i64: 2>, scalar_prefetch = 0 : i64, scratch_operands = 0 : i64, tpu.core_type = #tpu.core_type<tc>, window_params = [{transform_indices = @transform_0, window_bounds = array<i64: 128, 16>}, {pipeline_mode = #tpu.pipeline_mode<synchronous>, transform_indices = @transform_1, window_bounds = array<i64: 16, 128>}, {pipeline_mode = #tpu.pipeline_mode<synchronous>, transform_indices = @transform_2, window_bounds = array<i64: 1, 128>}, {pipeline_mode = #tpu.pipeline_mode<synchronous>, transform_indices = @transform_3, window_bounds = array<i64: 128, 128>}, {pipeline_mode = #tpu.pipeline_mode<synchronous>, transform_indices = @transform_4, window_bounds = array<i64: 1, 128>}, {transform_indices = @transform_5, window_bounds = array<i64: 128, 128>}]} {
    %c0 = arith.constant 0 : index
    %c0_0 = arith.constant 0 : index
    %0 = vector.load %arg1[%c0, %c0_0] : memref<128x16xf32, #tpu.memory_space<vmem>>, vector<128x16xf32>
    %1 = arith.truncf %0 : vector<128x16xf32> to vector<128x16xbf16>
    %c0_1 = arith.constant 0 : index
    %c0_2 = arith.constant 0 : index
    %2 = vector.load %arg2[%c0_1, %c0_2] : memref<16x128xbf16, #tpu.memory_space<vmem>>, vector<16x128xbf16>
    %cst = arith.constant dense<0.000000e+00> : vector<128x128xf32>
    %3 = tpu.matmul %1, %2, %cst {dimension_numbers = #tpu.dot_dimension_numbers<[1], [0], [0], [1], [0, 0, 1, 1], [], []>} : vector<128x16xbf16>, vector<16x128xbf16>, vector<128x128xf32> -> vector<128x128xf32>
    %c0_3 = arith.constant 0 : index
    %c0_4 = arith.constant 0 : index
    %4 = vector.load %arg3[%c0_3, %c0_4] : memref<1x128xf32, #tpu.memory_space<vmem>>, vector<1x128xf32>
    %5 = vector.broadcast %4 : vector<1x128xf32> to vector<128x128xf32>
    %6 = arith.addf %3, %5 : vector<128x128xf32>
    %cst_5 = arith.constant 0.000000e+00 : f32
    %7 = vector.broadcast %cst_5 : f32 to vector<128x128xf32>
    %8 = arith.maximumf %6, %7 : vector<128x128xf32>
    %9 = arith.truncf %8 : vector<128x128xf32> to vector<128x128xbf16>
    %c0_6 = arith.constant 0 : index
    %c0_7 = arith.constant 0 : index
    %10 = vector.load %arg4[%c0_6, %c0_7] : memref<128x128xbf16, #tpu.memory_space<vmem>>, vector<128x128xbf16>
    %cst_8 = arith.constant dense<0.000000e+00> : vector<128x128xf32>
    %11 = tpu.matmul %9, %10, %cst_8 {dimension_numbers = #tpu.dot_dimension_numbers<[1], [0], [0], [1], [0, 0, 1, 1], [], []>} : vector<128x128xbf16>, vector<128x128xbf16>, vector<128x128xf32> -> vector<128x128xf32>
    %c0_9 = arith.constant 0 : index
    %c0_10 = arith.constant 0 : index
    %12 = vector.load %arg5[%c0_9, %c0_10] : memref<1x128xf32, #tpu.memory_space<vmem>>, vector<1x128xf32>
    %13 = vector.broadcast %12 : vector<1x128xf32> to vector<128x128xf32>
    %14 = arith.addf %11, %13 : vector<128x128xf32>
    %cst_11 = arith.constant 0.000000e+00 : f32
    %15 = vector.broadcast %cst_11 : f32 to vector<128x128xf32>
    %16 = arith.maximumf %14, %15 : vector<128x128xf32>
    %c0_12 = arith.constant 0 : index
    %c0_13 = arith.constant 0 : index
    %17 = vector.load %arg6[%c0_12, %c0_13] : memref<128x128xf32, #tpu.memory_space<vmem>>, vector<128x128xf32>
    tpu.vector_store %arg6[%c0_12, %c0_13], %16 {strides = array<i32>} : memref<128x128xf32, #tpu.memory_space<vmem>>, vector<128x128xf32>,
    return
  }
  func.func @transform_0(%arg0: i32) -> (i32, i32) {
    %c0_i32 = arith.constant 0 : i32
    %c0_i32_0 = arith.constant 0 : i32
    return %arg0, %c0_i32 : i32, i32
  }
  func.func @transform_1(%arg0: i32) -> (i32, i32) {
    %c0_i32 = arith.constant 0 : i32
    %c0_i32_0 = arith.constant 0 : i32
    %c0_i32_1 = arith.constant 0 : i32
    return %c0_i32, %c0_i32_0 : i32, i32
  }
  func.func @transform_2(%arg0: i32) -> (i32, i32) {
    %c0_i32 = arith.constant 0 : i32
    %c0_i32_0 = arith.constant 0 : i32
    %c0_i32_1 = arith.constant 0 : i32
    return %c0_i32, %c0_i32_0 : i32, i32
  }
  func.func @transform_3(%arg0: i32) -> (i32, i32) {
    %c0_i32 = arith.constant 0 : i32
    %c0_i32_0 = arith.constant 0 : i32
    %c0_i32_1 = arith.constant 0 : i32
    return %c0_i32, %c0_i32_0 : i32, i32
  }
  func.func @transform_4(%arg0: i32) -> (i32, i32) {
    %c0_i32 = arith.constant 0 : i32
    %c0_i32_0 = arith.constant 0 : i32
    %c0_i32_1 = arith.constant 0 : i32
    return %c0_i32, %c0_i32_0 : i32, i32
  }
  func.func @transform_5(%arg0: i32) -> (i32, i32) {
    %c0_i32 = arith.constant 0 : i32
    %c0_i32_0 = arith.constant 0 : i32
    return %arg0, %c0_i32 : i32, i32
  }
}

</mosaic_0001>

<bundles_post_ra>
// kernel: _fc_forward.1
= control target key start
LH: loop header
LB: loop body
LE: loop exit
PB: predicated region body
PF: predicated region fallthrough
CT: control target
= control target key end

     0   :  { %10 = vsyncpa [#allocation3], 0  ;;  %s986_s0 = inlined_call_operand.vmem [shape: f32[256,16], index: 0, kind: input, shape index: {}]   ;;  %s987_s1 = inlined_call_operand.vmem [shape: bf16[16,128], index: 1, kind: input, shape index: {}]   ;;  %s988_s2 = inlined_call_operand.vmem [shape: f32[1,128], index: 2, kind: input, shape index: {}]   ;;  %s989_s3 = inlined_call_operand.vmem [shape: bf16[128,128], index: 3, kind: input, shape index: {}]   ;;  %s990_s4 = inlined_call_operand.vmem [shape: f32[1,128], index: 4, kind: input, shape index: {}]   ;;  %s991_s5 = inlined_call_operand.hbm [shape: f32[256,128], index: 5, kind: output, shape index: {}]  }
   0x1   :  { %12 = vsyncpa [#allocation3 + $0x1], 0  ;;  %s802_s18 = smov 0   ;;  %s804_s19 = smov 0  }
   0x2   :  { %s806_s20 = smov 0   ;;  %s808_s21 = smov 0  }
   0x3 LB: > { %s823_s22 = sadd.s32 4294967295, %s768_s21   ;;  %s588_s23 = sadd.s32 4294967294, %s768_s21   ;;  %s768_s21 = sphi %s808_s21, %s997_s21   ;;  %s764_s20 = sphi %s806_s20, %s996_s20   ;;  %s760_s19 = sphi %s804_s19, %s995_s19   ;;  %s756_s18 = sphi %s802_s18, %s994_s18  }
   0x4   : > { %s827_s24 = sadd.s32 1, %s768_s21   ;;  %s135_s25 = sadd.s32 1, %s764_s20 }
   0x5   : > { %s132_s26 = ssub.s32 %s768_s21, %s827_s24  ;;  %p145_p0 = scmp.ne.s32.totalorder %s764_s20, %s760_s19 }
   0x6   : > { %p133_p1 = scmp.eq.s32.totalorder %s132_s26, 0  ;;  %p146_p2 = scmp.eq.s32.totalorder %s823_s22, 1 }
   0x7   : > { %p151_p3 = scmp.ne.s32.totalorder %s760_s19, %s756_s18  ;;  %p152_p4 = scmp.eq.s32.totalorder %s588_s23, 1 }
   0x8   : > { %s838_s27 = scalar_select %p133_p1, %s764_s20, %s135_s25  }
   0x9   : > { %p840_p5 = por %p146_p2, %p145_p0  ;;  %p844_p6 = por %p152_p4, %p151_p3 }
   0xa   : > { %p591_p7 = scmp.ge.s32.totalorder %s768_s21, 1  ;;  %p191_p8 = scmp.lt.s32.totalorder %s768_s21, 3 }
   0xc   : > { %p192_p9 = pnand %p591_p7, %p191_p8 }
   0xd   : > { %s593_s7 = sshll.u32 (!%p192_p9), %s823_s22, 4  ;;  %s216_s14 = sand.u32 (!%p192_p9), 1, %s760_s19  }
   0xe   : > { %195 = sbr.rel (%p192_p9) target bundleno = 425 (0x1a9), region = 40  ;;  %p220_p10 = scmp.lt.s32.totalorder (!%p192_p9), %s593_s7, 31 }
   0xf   : > { %s592_s17 = sshll.u32 (!%p192_p9), %s216_s14, 7  ;;  %s653_s25 = sshll.u32 (!%p192_p9), %s823_s22, 7 }
  0x10   : > { %s919_s23 = scalar_lea.vmem (!%p192_p9), [#allocation2], %s592_s17  ;;  %s522_s6 = scalar_lea.hbm (!%p192_p9), %s991_s5, %s653_s25 }
  0x11   : > { %s511_s9 = scalar_lea.sflag (!%p192_p9), [#allocation3], %s216_s14  ;;  %s726_s13 = scalar_lea.hbm (!%p192_p9), %s991_s5, 256 }
  0x13   : > { %v644_v0 = vld [vmem:[%s987_s1] sm:$0xff]  ;;  %s999_s7 = smov (!%p220_p10, %s593_s7), 31  ;;  %vm263_vm0 = vcmask 130048   ;;  %v652_v13 = vld [vmem:[%s989_s3 + $0x38] sm:$0xff]  ;;  %v651_v14 = vld [vmem:[%s989_s3 + $0x30] sm:$0xff] }
  0x14   : > { %295 = vmatpush.bf16.msra.mxu0 %v644_v0  ;;  %654 = vmatpush.bf16.msra.mxu3 %v644_v0  ;;  %s594_s8 = sshll.u32 %s999_s7, 3  ;;  %v650_v15 = vld [vmem:[%s989_s3 + $0x28] sm:$0xff]  ;;  %v649_v21 = vld [vmem:[%s989_s3 + $0x20] sm:$0xff]  ;;  %v648_v29 = vld [vmem:[%s989_s3 + $0x18] sm:$0xff]  ;;  %s523_s7 = sshll.u32 %s919_s23, 4  ;;  %s524_s7 = int_to_ptr.vmem [resolvable:$true] %s523_s7 }
  0x15   : > { %s857_s11 = scalar_lea.vmem %s986_s0, %s594_s8  ;;  %429 = vmatpush.bf16.msra.mxu1 %v652_v13  ;;  %655 = vmatpush.bf16.msra.mxu2 %v652_v13  ;;  %v647_v30 = vld [vmem:[%s989_s3 + $0x10] sm:$0xff]  ;;  %v646_v31 = vld [vmem:[%s989_s3 + $0x8] sm:$0xff]  ;;  %v645_v32 = vld [vmem:[%s989_s3] sm:$0xff]  ;;  %s525_s8 = sshll.u32 %s522_s6, 4  ;;  %s526_s8 = int_to_ptr.hbm [resolvable:$true] %s525_s8 }
  0x16   : > { %v227_v1 = vld [vmem:[%s857_s11] sm:$0xff]  ;;  %v228_v2 = vld [vmem:[%s857_s11 + $0x8] sm:$0xff]  ;;  %v229_v4 = vld [vmem:[%s857_s11 + $0x10] sm:$0xff]  ;;  %s720_s10 = sshra.s32 %s526_s8, 4  ;;  %s721_s10 = int_to_ptr.hbm [resolvable:$true] %s720_s10 }
  0x17   : > { %v243_v3 = vpack.c.bf16 %v228_v2, %v227_v1  ;;  %v230_v5 = vld [vmem:[%s857_s11 + $0x18] sm:$0xff]  ;;  %v231_v7 = vld [vmem:[%s857_s11 + $0x20] sm:$0xff]  ;;  %v232_v8 = vld [vmem:[%s857_s11 + $0x28] sm:$0xff]  ;;  %s722_s22 = scalar_lea.hbm %s721_s10, 128  ;;  %p727_p0 = scmp.lt.s32.totalorder %s721_s10, %s991_s5 }
  0x18   : > { %v244_v6 = vpack.c.bf16 %v230_v5, %v229_v4  ;;  %v245_v9 = vpack.c.bf16 %v232_v8, %v231_v7  ;;  %v237_v10 = vld [vmem:[%s857_s11 + $0x50] sm:$0xff]  ;;  %v238_v11 = vld [vmem:[%s857_s11 + $0x58] sm:$0xff]  ;;  %v239_v18 = vld [vmem:[%s857_s11 + $0x60] sm:$0xff]  ;;  %p723_p11 = scmp.ne.s32.totalorder %s721_s10, %s722_s22  ;;  %p728_p1 = scmp.lt.s32.totalorder %s726_s13, %s722_s22 }
  0x19   : > { %599 = vmatmul.msk.bf16.vlgmr.msra.gmra.mxu0 %vm263_vm0, %v243_v3  ;;  %v248_v12 = vpack.c.bf16 %v238_v11, %v237_v10  ;;  %430 = vmatpush.bf16.msra.mxu1 %v651_v14  ;;  %v233_v16 = vld [vmem:[%s857_s11 + $0x30] sm:$0xff]  ;;  %v234_v17 = vld [vmem:[%s857_s11 + $0x38] sm:$0xff]  ;;  %v240_v19 = vld [vmem:[%s857_s11 + $0x68] sm:$0xff] }
  0x1a   : > { %656 = vmatpush.bf16.msra.mxu2 %v651_v14  ;;  %v246_v20 = vpack.c.bf16 %v234_v17, %v233_v16  ;;  %v249_v22 = vpack.c.bf16 %v240_v19, %v239_v18  ;;  %v235_v23 = vld [vmem:[%s857_s11 + $0x40] sm:$0xff]  ;;  %v236_v24 = vld [vmem:[%s857_s11 + $0x48] sm:$0xff]  ;;  %v241_v25 = vld [vmem:[%s857_s11 + $0x70] sm:$0xff]  ;;  %p724_p12 = pnand %p723_p11, %p840_p5  ;;  %p729_p2 = por %p728_p1, %p727_p0 }
  0x1b   : > { %604 = vmatmul.msk.bf16.vlgmr.msra.gmra.mxu3 %vm263_vm0, %v248_v12  ;;  %v242_v26 = vld [vmem:[%s857_s11 + $0x78] sm:$0xff]  ;;  %v247_v27 = vpack.c.bf16 %v236_v24, %v235_v23  ;;  %v704_v34 = vld [vmem:[%s988_s2] ss:$0 sm:$0xff] }
  0x1c   : > { %v250_v28 = vpack.c.bf16 %v242_v26, %v241_v25  ;;  %v914_v26 = vld [vmem:[%s990_s4] ss:$0 sm:$0xff]  ;;  %p725_p13 = pneg %p724_p12 }
  0x1d   : > { %431 = vmatpush.bf16.msra.mxu1 %v650_v15 }
  0x1e   : > { %657 = vmatpush.bf16.msra.mxu2 %v650_v15  ;;  %p730_p3 = pnand %p729_p2, %p725_p13 }
  0x21   : > { %432 = vmatpush.bf16.msra.mxu1 %v649_v21 }
  0x22   : > { %658 = vmatpush.bf16.msra.mxu2 %v649_v21 }
  0x25   : > { %433 = vmatpush.bf16.msra.mxu1 %v648_v29 }
  0x26   : > { %659 = vmatpush.bf16.msra.mxu2 %v648_v29 }
  0x29   : > { %600 = vmatmul.msk.bf16.gmra.mxu0 %vm263_vm0, %v244_v6  ;;  %434 = vmatpush.bf16.msra.mxu1 %v647_v30 }
  0x2a   : > { %660 = vmatpush.bf16.msra.mxu2 %v647_v30 }
  0x2b   : > { %605 = vmatmul.msk.bf16.gmra.mxu3 %vm263_vm0, %v249_v22 }
  0x2d   : > { %435 = vmatpush.bf16.msra.mxu1 %v646_v31 }
  0x2e   : > { %661 = vmatpush.bf16.msra.mxu2 %v646_v31 }
  0x31   : > { %436 = vmatpush.bf16.msra.mxu1 %v645_v32 }
  0x32   : > { %662 = vmatpush.bf16.msra.mxu2 %v645_v32 }
  0x39   : > { %601 = vmatmul.msk.bf16.gmra.mxu0 %vm263_vm0, %v245_v9 }
  0x3b   : > { %606 = vmatmul.msk.bf16.gmra.mxu3 %vm263_vm0, %v250_v28 }
  0x49   : > { %602 = vmatmul.msk.bf16.gmra.mxu0 %vm263_vm0, %v246_v20 }
  0x59   : > { %603 = vmatmul.msk.bf16.gmra.mxu0 %vm263_vm0, %v247_v27 }
  0x96   : > { %v297_v33 = vpop.f32.mrf.mxu0 }
  0x97   : > { %v298_v35 = vadd.f32 %v704_v34, %v297_v33 }
  0x99   : > { %v337_v38 = vmax.f32 %v298_v35, 0.0 }
  0x9e   : > { %v299_v36 = vpop.f32.mrf.mxu0  ;;  %v322_v63 = vpop.f32.mrf.mxu3 }
  0x9f   : > { %v300_v37 = vadd.f32 %v704_v34, %v299_v36  ;;  %v323_v8 = vadd.f32 %v704_v34, %v322_v63 }
  0xa1   : > { %v338_v39 = vmax.f32 %v300_v37, 0.0  ;;  %v347_v10 = vmax.f32 %v323_v8, 0.0 }
  0xa3   : > { %v353_v40 = vpack.c.bf16 %v338_v39, %v337_v38 }
  0xa5   : > { %437 = vmatmul.bf16.vlgmr.msra.gmra.mxu1 %v353_v40 }
  0xa6   : > { %v302_v41 = vpop.f32.mrf.mxu0  ;;  %v324_v3 = vpop.f32.mrf.mxu3 }
  0xa7   : > { %v303_v42 = vadd.f32 %v704_v34, %v302_v41  ;;  %v325_v9 = vadd.f32 %v704_v34, %v324_v3 }
  0xa9   : > { %v339_v45 = vmax.f32 %v303_v42, 0.0  ;;  %v348_v11 = vmax.f32 %v325_v9, 0.0 }
  0xab   : > { %v358_v12 = vpack.c.bf16 %v348_v11, %v347_v10 }
  0xae   : > { %v304_v43 = vpop.f32.mrf.mxu0  ;;  %v327_v7 = vpop.f32.mrf.mxu3 }
  0xaf   : > { %v305_v44 = vadd.f32 %v704_v34, %v304_v43  ;;  %v328_v14 = vadd.f32 %v704_v34, %v327_v7 }
  0xb1   : > { %v340_v46 = vmax.f32 %v305_v44, 0.0  ;;  %v349_v17 = vmax.f32 %v328_v14, 0.0 }
  0xb3   : > { %v354_v47 = vpack.c.bf16 %v340_v46, %v339_v45 }
  0xb5   : > { %442 = vmatmul.bf16.gmra.mxu1 %v354_v47 }
  0xb6   : > { %v307_v48 = vpop.f32.mrf.mxu0  ;;  %v329_v13 = vpop.f32.mrf.mxu3 }
  0xb7   : > { %v308_v49 = vadd.f32 %v704_v34, %v307_v48  ;;  %v330_v15 = vadd.f32 %v704_v34, %v329_v13 }
  0xb9   : > { %v341_v52 = vmax.f32 %v308_v49, 0.0  ;;  %v350_v18 = vmax.f32 %v330_v15, 0.0 }
  0xbb   : > { %v359_v19 = vpack.c.bf16 %v350_v18, %v349_v17 }
  0xbe   : > { %v309_v50 = vpop.f32.mrf.mxu0  ;;  %v332_v16 = vpop.f32.mrf.mxu3 }
  0xbf   : > { %v310_v51 = vadd.f32 %v704_v34, %v309_v50  ;;  %v333_v21 = vadd.f32 %v704_v34, %v332_v16 }
  0xc1   : > { %v342_v53 = vmax.f32 %v310_v51, 0.0  ;;  %v351_v23 = vmax.f32 %v333_v21, 0.0 }
  0xc3   : > { %v355_v54 = vpack.c.bf16 %v342_v53, %v341_v52 }
  0xc5   : > { %447 = vmatmul.bf16.gmra.mxu1 %v355_v54 }
  0xc6   : > { %v312_v55 = vpop.f32.mrf.mxu0  ;;  %v334_v20 = vpop.f32.mrf.mxu3 }
  0xc7   : > { %v313_v56 = vadd.f32 %v704_v34, %v312_v55  ;;  %v335_v22 = vadd.f32 %v704_v34, %v334_v20 }
  0xc9   : > { %v343_v59 = vmax.f32 %v313_v56, 0.0  ;;  %v352_v24 = vmax.f32 %v335_v22, 0.0 }
  0xcb   : > { %v360_v25 = vpack.c.bf16 %v352_v24, %v351_v23 }
  0xce   : > { %v314_v57 = vpop.f32.mrf.mxu0 }
  0xcf   : > { %v315_v58 = vadd.f32 %v704_v34, %v314_v57 }
  0xd1   : > { %v344_v60 = vmax.f32 %v315_v58, 0.0 }
  0xd3   : > { %v356_v61 = vpack.c.bf16 %v344_v60, %v343_v59 }
  0xd5   : > { %452 = vmatmul.bf16.gmra.mxu1 %v356_v61 }
  0xd6   : > { %v317_v62 = vpop.f32.mrf.mxu0 }
  0xd7   : > { %v318_v0 = vadd.f32 %v704_v34, %v317_v62 }
  0xd9   : > { %v345_v4 = vmax.f32 %v318_v0, 0.0 }
  0xde   : > { %v319_v1 = vpop.f32.mrf.mxu0 }
  0xdf   : > { %v320_v2 = vadd.f32 %v704_v34, %v319_v1 }
  0xe1   : > { %v346_v5 = vmax.f32 %v320_v2, 0.0 }
  0xe3   : > { %v357_v6 = vpack.c.bf16 %v346_v5, %v345_v4 }
  0xe5   : > { %457 = vmatmul.bf16.vlgmr.msra.gmra.mxu2 %v357_v6 }
  0xf5   : > { %462 = vmatmul.bf16.gmra.mxu2 %v358_v12 }
 0x105   : > { %467 = vmatmul.bf16.gmra.mxu2 %v359_v19 }
 0x115   : > { %472 = vmatmul.bf16.gmra.mxu2 %v360_v25 }
 0x122   : > { %v438_v27 = vpop.f32.mrf.mxu1 }
 0x123   : > { %v439_v28 = vadd.f32 %v914_v26, %v438_v27 }
 0x125   : > { %v478_v29 = vmax.f32 %v439_v28, 0.0 }
 0x127   : > { %494 = vst [vmem:[%s919_s23] sm:$0xff] %v478_v29 }
 0x12a   : > { %v440_v30 = vpop.f32.mrf.mxu1 }
 0x12b   : > { %v441_v31 = vadd.f32 %v914_v26, %v440_v30 }
 0x12d   : > { %v479_v32 = vmax.f32 %v441_v31, 0.0 }
 0x12f   : > { %495 = vst [vmem:[%s919_s23 + $0x8] sm:$0xff] %v479_v32 }
 0x132   : > { %v443_v33 = vpop.f32.mrf.mxu1 }
 0x133   : > { %v444_v34 = vadd.f32 %v914_v26, %v443_v33 }
 0x135   : > { %v480_v35 = vmax.f32 %v444_v34, 0.0 }
 0x137   : > { %496 = vst [vmem:[%s919_s23 + $0x10] sm:$0xff] %v480_v35 }
 0x13a   : > { %v445_v36 = vpop.f32.mrf.mxu1 }
 0x13b   : > { %v446_v37 = vadd.f32 %v914_v26, %v445_v36 }
 0x13d   : > { %v481_v38 = vmax.f32 %v446_v37, 0.0 }
 0x13f   : > { %497 = vst [vmem:[%s919_s23 + $0x18] sm:$0xff] %v481_v38 }
 0x142   : > { %v448_v39 = vpop.f32.mrf.mxu1 }
 0x143   : > { %v449_v40 = vadd.f32 %v914_v26, %v448_v39 }
 0x145   : > { %v482_v41 = vmax.f32 %v449_v40, 0.0 }
 0x147   : > { %498 = vst [vmem:[%s919_s23 + $0x20] sm:$0xff] %v482_v41 }
 0x14a   : > { %v450_v42 = vpop.f32.mrf.mxu1 }
 0x14b   : > { %v451_v43 = vadd.f32 %v914_v26, %v450_v42 }
 0x14d   : > { %v483_v44 = vmax.f32 %v451_v43, 0.0 }
 0x14f   : > { %499 = vst [vmem:[%s919_s23 + $0x28] sm:$0xff] %v483_v44 }
 0x152   : > { %v453_v45 = vpop.f32.mrf.mxu1 }
 0x153   : > { %v454_v46 = vadd.f32 %v914_v26, %v453_v45 }
 0x155   : > { %v484_v47 = vmax.f32 %v454_v46, 0.0 }
 0x157   : > { %500 = vst [vmem:[%s919_s23 + $0x30] sm:$0xff] %v484_v47 }
 0x15a   : > { %v455_v48 = vpop.f32.mrf.mxu1 }
 0x15b   : > { %v456_v49 = vadd.f32 %v914_v26, %v455_v48 }
 0x15d   : > { %v485_v50 = vmax.f32 %v456_v49, 0.0 }
 0x15f   : > { %501 = vst [vmem:[%s919_s23 + $0x38] sm:$0xff] %v485_v50 }
 0x168   : > { %v458_v51 = vpop.f32.mrf.mxu2 }
 0x169   : > { %v459_v52 = vadd.f32 %v914_v26, %v458_v51 }
 0x16b   : > { %v486_v53 = vmax.f32 %v459_v52, 0.0 }
 0x16d   : > { %502 = vst [vmem:[%s919_s23 + $0x40] sm:$0xff] %v486_v53 }
 0x170   : > { %v460_v54 = vpop.f32.mrf.mxu2 }
 0x171   : > { %v461_v55 = vadd.f32 %v914_v26, %v460_v54 }
 0x173   : > { %v487_v56 = vmax.f32 %v461_v55, 0.0 }
 0x175   : > { %503 = vst [vmem:[%s919_s23 + $0x48] sm:$0xff] %v487_v56 }
 0x178   : > { %v463_v57 = vpop.f32.mrf.mxu2 }
 0x179   : > { %v464_v58 = vadd.f32 %v914_v26, %v463_v57 }
 0x17b   : > { %v488_v59 = vmax.f32 %v464_v58, 0.0 }
 0x17d   : > { %504 = vst [vmem:[%s919_s23 + $0x50] sm:$0xff] %v488_v59 }
 0x180   : > { %v465_v60 = vpop.f32.mrf.mxu2 }
 0x181   : > { %v466_v61 = vadd.f32 %v914_v26, %v465_v60 }
 0x183   : > { %v489_v62 = vmax.f32 %v466_v61, 0.0 }
 0x185   : > { %505 = vst [vmem:[%s919_s23 + $0x58] sm:$0xff] %v489_v62 }
 0x188   : > { %v468_v63 = vpop.f32.mrf.mxu2 }
 0x189   : > { %v469_v0 = vadd.f32 %v914_v26, %v468_v63 }
 0x18b   : > { %v490_v1 = vmax.f32 %v469_v0, 0.0 }
 0x18d   : > { %506 = vst [vmem:[%s919_s23 + $0x60] sm:$0xff] %v490_v1 }
 0x190   : > { %v470_v2 = vpop.f32.mrf.mxu2 }
 0x191   : > { %v471_v3 = vadd.f32 %v914_v26, %v470_v2 }
 0x193   : > { %v491_v4 = vmax.f32 %v471_v3, 0.0 }
 0x195   : > { %507 = vst [vmem:[%s919_s23 + $0x68] sm:$0xff] %v491_v4 }
 0x198   : > { %v473_v5 = vpop.f32.mrf.mxu2 }
 0x199   : > { %v474_v6 = vadd.f32 %v914_v26, %v473_v5 }
 0x19b   : > { %v492_v7 = vmax.f32 %v474_v6, 0.0 }
 0x19d   : > { %508 = vst [vmem:[%s919_s23 + $0x70] sm:$0xff] %v492_v7 }
 0x1a0   : > { %v475_v8 = vpop.f32.mrf.mxu2 }
 0x1a1   : > { %v476_v9 = vadd.f32 %v914_v26, %v475_v8 }
 0x1a3   : > { %v493_v10 = vmax.f32 %v476_v9, 0.0 }
 0x1a5   : > { %509 = vst [vmem:[%s919_s23 + $0x78] sm:$0xff] %v493_v10 }
 0x1a6   : > { %733 = shalt.err (!%p730_p3)
}
 0x1a7   : > { %s770_s14 = smov 128   ;;  %s771_s17 = smov 8  }
 0x1a8   : > { %663 = dma.vmem_to_hbm [thread:$0]  (%p840_p5), %s524_s7, 2048, %s526_s8, %s511_s9, %s770_s14, %s770_s14, %s771_s17  }
 0x1a9 PF: > { %p669_p4 = scmp.ge.s32.totalorder %s768_s21, 2  ;;  %s540_s23 = sand.u32 1, %s756_s18  }
 0x1aa   : > { %s541_s25 = scalar_lea.sflag [#allocation3], %s540_s23 }
 0x1ab   : > { %p666_p7 = pnand %p669_p4, %p844_p6 }
 0x1ad   : > { %p667_p8 = pneg %p666_p7 }
 0x1af   : > { %751 = dma.done.wait (%p667_p8), %s541_s25, 2048  }
 0x1b0   : > { %753 = vsyncadd (%p667_p8), %s541_s25, 4294965248  ;;  %p15_p9 = scmp.ge.s32.totalorder %s827_s24, 4   ;;  %s994_s18 = smov %s760_s19 }
 0x1b1   : > { %s995_s19 = smov %s764_s20  ;;  %s996_s20 = smov %s838_s27 }
 0x1b2   : > { %s997_s21 = smov %s827_s24  ;;  %17 = sbr.rel (!%p15_p9) target bundleno = 3 (0x3), region = 75 }
 0x1b7   :  { %547 = vsyncpa [#allocation3], 1 }
 0x1b8   :  { %549 = vsyncpa [#allocation3 + $0x1], 1 }

</bundles_post_ra>
